<compile_context>
chip_gen: v5e
topology: v5e:2x2
jax: 0.10.0
libtpu: 0.0.40
codegen_flags: <defaults>
</compile_context>

<pallas_src>
import functools

import jax
import jax.numpy as jnp
from jax.experimental import pallas as pl
from jax.experimental.pallas import tpu as pltpu

_LANES = 128
_SUBLANES = 8
_CHUNK = _SUBLANES * _LANES          # 1024 elements: kernel slab granularity
_MAX_TILE_ROWS = 4096                # (4096,128) f32 block = 2 MiB per input
_N_PAR = 2                           # leading 'parallel' axis (2 TCs on v7x)


def _round_up(n, m):
    return ((n + m - 1) // m) * m


def _mse_partial_kernel(x_ref, t_ref, out_ref, *, tile_rows, steps_per_core,
                        valid_rows, need_mask):
    """Accumulates per-(sublane,lane) partial sums of (x - t)^2 into out_ref."""
    c = pl.program_id(0)           # parallel slice (TensorCore on v7x)
    i = pl.program_id(1)           # sequential reduction step

    @pl.when(i == 0)
    def _():
        out_ref[...] = jnp.zeros_like(out_ref)

    d = x_ref[...].astype(jnp.float32) - t_ref[...].astype(jnp.float32)
    sq = d * d

    if need_mask:
        # Zero out rows past the real extent (partial / over-covered blocks).
        row0 = (c * steps_per_core + i) * tile_rows
        rid = row0 + jax.lax.broadcasted_iota(jnp.int32, sq.shape, 0)
        sq = jnp.where(rid < valid_rows, sq, 0.0)

    # Fold (tile_rows,128) -> (8,128) with pure vector adds; the expensive
    # cross-lane reduction is deferred to the wrapper (runs once).
    out_ref[...] += jnp.sum(
        sq.reshape(tile_rows // _SUBLANES, _SUBLANES, _LANES), axis=0)


def _mse_sum_pallas(x2d, t2d):
    """sum((x - t)^2) where x2d/t2d are (rows,128) with rows a multiple of 8."""
    rows = x2d.shape[0]
    tile_rows = min(_MAX_TILE_ROWS, _round_up(pl.cdiv(rows, _N_PAR), _SUBLANES))
    total_blocks = pl.cdiv(rows, tile_rows)
    steps_per_core = pl.cdiv(total_blocks, _N_PAR)
    covered_rows = _N_PAR * steps_per_core * tile_rows
    need_mask = covered_rows != rows

    def in_map(c, i):
        blk = c * steps_per_core + i
        if need_mask:
            # Clamp so over-coverage steps re-read the last real block (their
            # contribution is masked to 0 in-kernel) instead of issuing a fully
            # out-of-bounds DMA.
            blk = jnp.minimum(blk, total_blocks - 1)
        return (blk, 0)

    kernel = functools.partial(
        _mse_partial_kernel, tile_rows=tile_rows, steps_per_core=steps_per_core,
        valid_rows=rows, need_mask=need_mask)

    itemsize = x2d.dtype.itemsize + t2d.dtype.itemsize
    partials = pl.pallas_call(
        kernel,
        out_shape=jax.ShapeDtypeStruct((_N_PAR * _SUBLANES, _LANES), jnp.float32),
        grid_spec=pltpu.PrefetchScalarGridSpec(
            num_scalar_prefetch=0,
            grid=(_N_PAR, steps_per_core),
            in_specs=[
                pl.BlockSpec((tile_rows, _LANES), in_map),
                pl.BlockSpec((tile_rows, _LANES), in_map),
            ],
            out_specs=pl.BlockSpec((_SUBLANES, _LANES), lambda c, i: (c, 0)),
        ),
        compiler_params=pltpu.CompilerParams(
            dimension_semantics=("parallel", "arbitrary"),
        ),
        cost_estimate=pl.CostEstimate(
            flops=3 * rows * _LANES,
            transcendentals=0,
            bytes_accessed=rows * _LANES * itemsize),
    )(x2d, t2d)

    # Final cross-lane reduction of 2*8*128 partials: trivial, done once.
    return jnp.sum(partials)


def _mse_loss_impl(x, target):
    total = x.size
    main = (total // _CHUNK) * _CHUNK

    xf = x.reshape(-1)     # free bitcast
    tf = target.reshape(-1)

    loss_sum = jnp.float32(0.0)
    if main:
        if main == total:
            x2d, t2d = xf.reshape(-1, _LANES), tf.reshape(-1, _LANES)
        else:
            # TODO(synk): ragged element count (rare for conv feature maps) —
            # the slice below copies the main slab once before the kernel runs.
            x2d = xf[:main].reshape(-1, _LANES)
            t2d = tf[:main].reshape(-1, _LANES)
        loss_sum = loss_sum + _mse_sum_pallas(x2d, t2d)
    if main != total:
        # Tail of < 1024 elements: negligible traffic, handled in plain JAX.
        dtail = xf[main:].astype(jnp.float32) - tf[main:].astype(jnp.float32)
        loss_sum = loss_sum + jnp.sum(dtail * dtail)

    return loss_sum / jnp.float32(total)


@jax.custom_vjp
def mse_loss_pallas(x, target):
    """Mean squared error over all elements (F.mse_loss, 'mean' reduction)."""
    return _mse_loss_impl(x, target)


def _mse_fwd(x, target):
    return _mse_loss_impl(x, target), (x, target)


def _mse_bwd(res, g):
    # d/dx mean((x-t)^2) = 2*(x-t)/N ; gradient wrt target is the negative.
    x, target = res
    d = x.astype(jnp.float32) - target.astype(jnp.float32)
    gx = (g * (2.0 / x.size)) * d
    return gx.astype(x.dtype), (-gx).astype(target.dtype)


mse_loss_pallas.defvjp(_mse_fwd, _mse_bwd)


class ContentLoss:
    """JAX/Pallas equivalent of the PyTorch ContentLoss module."""

    def __init__(self, target):
        # .detach() equivalent: stop gradients through the target.
        self.target = jax.lax.stop_gradient(target)
        self.loss = None

    def __call__(self, x):
        # NOTE: storing self.loss is a Python side effect (same hazard as the
        # PyTorch module if used under jit/scan).
        self.loss = mse_loss_pallas(x, self.target)
        return x  # pass-through, exactly like the PyTorch module


if __name__ == "__main__":
    key = jax.random.PRNGKey(0)
    k_in, k_tgt = jax.random.split(key)

    # Small NCHW shapes consistent with a conv feature map.
    shape = (2, 4, 16, 16)
    x = jax.random.normal(k_in, shape, dtype=jnp.float32)
    target = jax.random.normal(k_tgt, shape, dtype=jnp.float32)

    module = ContentLoss(target)
    out = module(x)

    out = jax.block_until_ready(out)
    loss = jax.block_until_ready(module.loss)

    # Sanity check against pure-JAX reference (F.mse_loss with mean reduction).
    ref = jnp.mean((x - target) ** 2)
    assert out.shape == x.shape and out.dtype == x.dtype
    assert jnp.allclose(loss, ref, rtol=1e-5, atol=1e-6), (loss, ref)

    print("KERNEL_OK")
</pallas_src>

<mosaic_0001>
module attributes {stable_mosaic.version = 11 : i64} {
  func.func @_mse_partial_kernel(%arg0: i32, %arg1: i32, %arg2: memref<8x128xf32, #tpu.memory_space<vmem>>, %arg3: memref<8x128xf32, #tpu.memory_space<vmem>>, %arg4: memref<8x128xf32, #tpu.memory_space<vmem>>) attributes {dimension_semantics = [#tpu.dimension_semantics<parallel>, #tpu.dimension_semantics<arbitrary>], iteration_bounds = array<i64: 2, 1>, scalar_prefetch = 0 : i64, scratch_operands = 0 : i64, tpu.core_type = #tpu.core_type<tc>, window_params = [{transform_indices = @transform_0, window_bounds = array<i64: 8, 128>}, {transform_indices = @transform_1, window_bounds = array<i64: 8, 128>}, {transform_indices = @transform_2, window_bounds = array<i64: 8, 128>}]} {
    %c0_i32 = arith.constant 0 : i32
    %0 = arith.cmpi eq, %arg1, %c0_i32 : i32
    %1 = arith.extui %0 : i1 to i32
    %c0_i32_0 = arith.constant 0 : i32
    %2 = arith.cmpi ne, %1, %c0_i32_0 : i32
    scf.if %2 {
      %cst_8 = arith.constant 0.000000e+00 : f32
      %12 = vector.broadcast %cst_8 : f32 to vector<8x128xf32>
      %c0_9 = arith.constant 0 : index
      %c0_10 = arith.constant 0 : index
      %13 = vector.load %arg4[%c0_9, %c0_10] : memref<8x128xf32, #tpu.memory_space<vmem>>, vector<8x128xf32>
      tpu.vector_store %arg4[%c0_9, %c0_10], %12 {strides = array<i32>} : memref<8x128xf32, #tpu.memory_space<vmem>>, vector<8x128xf32>,
    } else {
    }
    %c0 = arith.constant 0 : index
    %c0_1 = arith.constant 0 : index
    %3 = vector.load %arg2[%c0, %c0_1] : memref<8x128xf32, #tpu.memory_space<vmem>>, vector<8x128xf32>
    %c0_2 = arith.constant 0 : index
    %c0_3 = arith.constant 0 : index
    %4 = vector.load %arg3[%c0_2, %c0_3] : memref<8x128xf32, #tpu.memory_space<vmem>>, vector<8x128xf32>
    %5 = arith.subf %3, %4 : vector<8x128xf32>
    %6 = arith.mulf %5, %5 : vector<8x128xf32>
    %c0_4 = arith.constant 0 : index
    %c0_5 = arith.constant 0 : index
    %7 = vector.load %arg4[%c0_4, %c0_5] : memref<8x128xf32, #tpu.memory_space<vmem>>, vector<8x128xf32>
    %8 = vector.shape_cast %6 : vector<8x128xf32> to vector<1x8x128xf32>
    %cst = arith.constant dense<0.000000e+00> : vector<8x128xf32>
    %9 = vector.multi_reduction <add>, %8, %cst [0] : vector<1x8x128xf32> to vector<8x128xf32>
    %10 = arith.addf %7, %9 : vector<8x128xf32>
    %c0_6 = arith.constant 0 : index
    %c0_7 = arith.constant 0 : index
    %11 = vector.load %arg4[%c0_6, %c0_7] : memref<8x128xf32, #tpu.memory_space<vmem>>, vector<8x128xf32>
    tpu.vector_store %arg4[%c0_6, %c0_7], %10 {strides = array<i32>} : memref<8x128xf32, #tpu.memory_space<vmem>>, vector<8x128xf32>,
    return
  }
  func.func @transform_0(%arg0: i32, %arg1: i32) -> (i32, i32) {
    %c1_i32 = arith.constant 1 : i32
    %0 = arith.muli %arg0, %c1_i32 : i32
    %1 = arith.addi %0, %arg1 : i32
    %c0_i32 = arith.constant 0 : i32
    %c0_i32_0 = arith.constant 0 : i32
    return %1, %c0_i32 : i32, i32
  }
  func.func @transform_1(%arg0: i32, %arg1: i32) -> (i32, i32) {
    %c1_i32 = arith.constant 1 : i32
    %0 = arith.muli %arg0, %c1_i32 : i32
    %1 = arith.addi %0, %arg1 : i32
    %c0_i32 = arith.constant 0 : i32
    %c0_i32_0 = arith.constant 0 : i32
    return %1, %c0_i32 : i32, i32
  }
  func.func @transform_2(%arg0: i32, %arg1: i32) -> (i32, i32) {
    %c0_i32 = arith.constant 0 : i32
    %c0_i32_0 = arith.constant 0 : i32
    return %arg0, %c0_i32 : i32, i32
  }
}

</mosaic_0001>

<bundles_post_ra>
// kernel: tpu_custom_call.1
= control target key start
LH: loop header
LB: loop body
LE: loop exit
PB: predicated region body
PF: predicated region fallthrough
CT: control target
= control target key end

     0   :  { %7 = vsyncpa [#allocation3], 0  ;;  %s727_s0 = inlined_call_operand.hbm [shape: f32[16,128], index: 0, kind: input, shape index: {}]   ;;  %s728_s1 = inlined_call_operand.hbm [shape: f32[16,128], index: 1, kind: input, shape index: {}]   ;;  %s729_s2 = inlined_call_operand.hbm [shape: f32[16,128], index: 2, kind: output, shape index: {}]  }
   0x1   :  { %9 = vsyncpa [#allocation3 + $0x1], 0 }
   0x2   :  { %10 = vsyncpa [#allocation6], 0 }
   0x3   :  { %12 = vsyncpa [#allocation6 + $0x1], 0 }
   0x4   :  { %13 = vsyncpa [#allocation4], 0 }
   0x5   :  { %15 = vsyncpa [#allocation4 + $0x1], 0  ;;  %s599_s9 = smov 0   ;;  %s601_s10 = smov 0  }
   0x6   :  { %s603_s11 = smov 0   ;;  %s605_s12 = smov 0  }
   0x7   :  { %s607_s13 = smov 0   ;;  %s609_s14 = smov 0  }
   0x8 LB: > { %s352_s15 = sadd.s32 4294967295, %s582_s14   ;;  %s353_s16 = sadd.s32 4294967294, %s582_s14   ;;  %s582_s14 = sphi %s609_s14, %s21_s14   ;;  %s578_s13 = sphi %s607_s13, %s738_s13   ;;  %s574_s12 = sphi %s605_s12, %s737_s12   ;;  %s570_s11 = sphi %s603_s11, %s736_s11   ;;  %s566_s10 = sphi %s601_s10, %s735_s10   ;;  %s562_s9 = sphi %s599_s9, %s734_s9  }
   0x9   : > { %s33_s17 = sadd.s32 1, %s578_s13  ;;  %s42_s18 = sadd.s32 1, %s570_s11 }
   0xa   : > { %p35_p0 = scmp.ge.s32.totalorder %s33_s17, 2  ;;  %p49_p1 = scmp.ne.s32.totalorder %s570_s11, %s566_s10 }
   0xb   : > { %p50_p2 = scmp.eq.s32.totalorder %s582_s14, 0  ;;  %p55_p3 = scmp.ne.s32.totalorder %s566_s10, %s562_s9 }
   0xc   : > { %s740_s17 = smov (%p35_p0, %s33_s17), 0  ;;  %p56_p5 = scmp.eq.s32.totalorder %s352_s15, 0 }
   0xd   : > { %p640_p4 = por %p50_p2, %p49_p1  ;;  %s39_s20 = ssub.s32 %s578_s13, %s740_s17 }
   0xe   : > { %p107_p6 = scmp.eq.s32.totalorder %s352_s15, 1  ;;  %p40_p7 = scmp.eq.s32.totalorder %s39_s20, 0 }
   0xf   : > { %p646_p8 = por %p56_p5, %p55_p3  ;;  %p113_p10 = scmp.eq.s32.totalorder %s353_s16, 1 }
  0x10   : > { %p650_p9 = por %p107_p6, %p49_p1  ;;  %p355_p12 = scmp.ge.s32.totalorder %s582_s14, 2 }
  0x11   : > { %s655_s23 = scalar_select %p40_p7, %s570_s11, %s42_s18  }
  0x12   : > { %p657_p11 = por %p113_p10, %p55_p3  ;;  %p385_p13 = scmp.lt.s32.totalorder %s582_s14, 2 }
  0x13   : > { %s133_s25 = sand.u32 1, %s570_s11   ;;  %s357_s27 = sshll.u32 %s578_s13, 3 }
  0x14   : > { %s356_s26 = sshll.u32 %s133_s25, 3  ;;  %s142_s30 = scalar_lea.hbm %s727_s0, %s357_s27 }
  0x15   : > { %s137_s3 = scalar_lea.vmem [#allocation2], %s356_s26  ;;  %s144_s5 = sshll.u32 %s142_s30, 4  ;;  %s145_s5 = int_to_ptr.hbm [resolvable:$true] %s144_s5 }
  0x16   : > { %s146_s4 = sshll.u32 %s137_s3, 4  ;;  %p375_p0 = pnand %p385_p13, %p640_p4  ;;  %s147_s4 = int_to_ptr.vmem [resolvable:$true] %s146_s4 }
  0x17   : > { %p360_p1 = scmp.ge.s32.totalorder %s582_s14, 1  ;;  %p171_p2 = scmp.lt.s32.totalorder %s582_s14, 3 }
  0x18   : > { %s134_s6 = scalar_lea.sflag [#allocation3], %s133_s25  ;;  %s162_s15 = scalar_lea.hbm %s728_s1, %s357_s27 }
  0x19   : > { %377 = dma.hbm_to_vmem [thread:$0]  (!%p375_p0), %s145_s5, 128, %s147_s4, %s134_s6  }
  0x1a   : > { %p172_p3 = pnand %p360_p1, %p171_p2  ;;  %s157_s16 = scalar_lea.vmem [#allocation5], %s356_s26 }
  0x1b   : > { %s166_s18 = sshll.u32 %s157_s16, 4  ;;  %s164_s20 = sshll.u32 %s162_s15, 4  ;;  %s167_s18 = int_to_ptr.vmem [resolvable:$true] %s166_s18  ;;  %s165_s20 = int_to_ptr.hbm [resolvable:$true] %s164_s20 }
  0x1c   : > { %s154_s28 = scalar_lea.sflag [#allocation6], %s133_s25  ;;  %175 = sbr.rel (%p172_p3) target bundleno = 51 (0x33), region = 28 }
  0x1d   : > { %380 = dma.hbm_to_vmem [thread:$0]  (!%p375_p0), %s165_s20, 128, %s167_s18, %s154_s28  }
  0x1e   : > { %s676_s19 = sand.u32 (!%p172_p3), 1, %s566_s10  }
  0x1f   : > { %s361_s29 = sshll.u32 (!%p172_p3), %s676_s19, 3  ;;  %s178_s30 = scalar_lea.sflag (!%p172_p3), [#allocation3], %s676_s19 }
  0x20   : > { %s181_s3 = scalar_lea.vmem (!%p172_p3), [#allocation2], %s361_s29 }
  0x21   : > { %549 = dma.done.wait (%p646_p8), %s178_s30, 128  }
  0x22   : > { %551 = vsyncadd (%p646_p8), %s178_s30, 4294967168  ;;  %s188_s26 = scalar_lea.sflag [#allocation6], %s676_s19  ;;  %s191_s25 = scalar_lea.vmem [#allocation5], %s361_s29 }
  0x23   : > { %553 = dma.done.wait (%p646_p8), %s188_s26, 128  }
  0x24   : > { %555 = vsyncadd (%p646_p8), %s188_s26, 4294967168  ;;  %s365_s27 = sshll.u32 %s574_s12, 3  ;;  %v225_v0 = vld [vmem:[%s181_s3] sm:$0xff]  ;;  %v226_v1 = vld [vmem:[%s191_s25] sm:$0xff]  ;;  %s217_s7 = scalar_lea.vmem [#allocation7], %s361_s29 }
  0x25   : > { %s244_s6 = scalar_lea.hbm %s729_s2, %s365_s27  ;;  %v227_v2 = vsub.f32 %v225_v0, %v226_v1  ;;  %s246_s8 = sshll.u32 %s217_s7, 4  ;;  %s247_s8 = int_to_ptr.vmem [resolvable:$true] %s246_s8 }
  0x26   : > { %s248_s15 = sshll.u32 %s244_s6, 4  ;;  %s234_s21 = scalar_lea.sflag [#allocation4], %s676_s19  ;;  %s249_s15 = int_to_ptr.hbm [resolvable:$true] %s248_s15 }
  0x27   : > { %v228_v3 = vmul.f32 %v227_v2, %v227_v2  ;;  %s510_s16 = sshra.s32 %s249_s15, 4  ;;  %s516_s28 = scalar_lea.hbm %s729_s2, 16  ;;  %s511_s16 = int_to_ptr.hbm [resolvable:$true] %s510_s16 }
  0x28   : > { %s512_s18 = scalar_lea.hbm %s511_s16, 8  ;;  %p517_p7 = scmp.lt.s32.totalorder %s511_s16, %s729_s2 }
  0x29   : > { %232 = vst [vmem:[%s217_s7] sm:$0xff] %v228_v3  ;;  %p513_p4 = scmp.ne.s32.totalorder %s511_s16, %s512_s18  ;;  %p518_p8 = scmp.lt.s32.totalorder %s516_s28, %s512_s18 }
  0x2b   : > { %p514_p5 = pnand %p513_p4, %p650_p9  ;;  %p519_p10 = por %p518_p8, %p517_p7 }
  0x2d   : > { %p515_p6 = pneg %p514_p5 }
  0x2f   : > { %p520_p13 = pnand %p519_p10, %p515_p6 }
  0x31   : > { %523 = shalt.err (!%p520_p13)
}
  0x32   : > { %372 = dma.vmem_to_hbm [thread:$0]  (%p650_p9), %s247_s8, 128, %s249_s15, %s234_s21  }
  0x33 PF: > { %s260_s19 = sand.u32 1, %s562_s9   ;;  %p382_p0 = pnand %p355_p12, %p657_p11 }
  0x34   : > { %s261_s3 = scalar_lea.sflag [#allocation4], %s260_s19 }
  0x35   : > { %p383_p1 = pneg %p382_p0 }
  0x37   : > { %557 = dma.done.wait (%p383_p1), %s261_s3, 128  }
  0x38   : > { %559 = vsyncadd (%p383_p1), %s261_s3, 4294967168  ;;  %s21_s14 = sadd.s32 1, %s582_s14   ;;  %s734_s9 = smov %s566_s10 }
  0x39   : > { %p18_p2 = scmp.ge.s32.totalorder %s21_s14, 4   ;;  %s735_s10 = smov %s570_s11 }
  0x3a   : > { %s736_s11 = smov %s655_s23  ;;  %s737_s12 = smov %s578_s13 }
  0x3b   : > { %s738_s13 = smov %s740_s17  ;;  %20 = sbr.rel (!%p18_p2) target bundleno = 8 (0x8), region = 90 }
  0x40   :  { %267 = vsyncpa [#allocation3], 1 }
  0x41   :  { %269 = vsyncpa [#allocation3 + $0x1], 1 }
  0x42   :  { %270 = vsyncpa [#allocation6], 1 }
  0x43   :  { %272 = vsyncpa [#allocation6 + $0x1], 1 }
  0x44   :  { %273 = vsyncpa [#allocation4], 1 }
  0x45   :  { %275 = vsyncpa [#allocation4 + $0x1], 1 }

</bundles_post_ra>
